<compile_context>
chip_gen: v5e
topology: v5e:2x2
jax: 0.10.0
libtpu: 0.0.40
codegen_flags: <defaults>
</compile_context>

<pallas_src>
import jax
import jax.numpy as jnp
from jax.experimental import pallas as pl
from jax.experimental.pallas import tpu as pltpu

OUT_DIM = 28 * 28     # 784
M_TILE_MAX = 1024     # per-step batch tile (multiple of 8)


def _round_up(n, m):
    return ((n + m - 1) // m) * m


def decoder_kernel(x_ref,
                   w1_ref, b1_ref,
                   w2_ref, b2_ref,
                   w3_ref, b3_ref,
                   w4_ref, b4_ref,
                   o_ref):
    """Fused 4-layer MLP forward on one batch tile.

    All matmuls: bf16 x bf16 -> f32 accumulation on the MXU; bias add + ReLU in
    f32 on the VPU.
    """
    # Layer 1: (M, 3) @ (3, 12) + (1, 12) -> ReLU
    h = jnp.dot(x_ref[...].astype(jnp.bfloat16), w1_ref[...],
                preferred_element_type=jnp.float32) + b1_ref[...]
    h = jnp.maximum(h, 0.0)

    # Layer 2: (M, 12) @ (12, 64) + (1, 64) -> ReLU
    h = jnp.dot(h.astype(jnp.bfloat16), w2_ref[...],
                preferred_element_type=jnp.float32) + b2_ref[...]
    h = jnp.maximum(h, 0.0)

    # Layer 3: (M, 64) @ (64, 128) + (1, 128) -> ReLU
    h = jnp.dot(h.astype(jnp.bfloat16), w3_ref[...],
                preferred_element_type=jnp.float32) + b3_ref[...]
    h = jnp.maximum(h, 0.0)

    # Layer 4: (M, 128) @ (128, 784) + (1, 784)   (no activation)
    y = jnp.dot(h.astype(jnp.bfloat16), w4_ref[...],
                preferred_element_type=jnp.float32) + b4_ref[...]

    o_ref[...] = y.astype(o_ref.dtype)


def prepare_params(params):
    """Cast weights to bf16 (DMA-light, fast MXU path); biases stay f32, reshaped
    to (1, N) for a clean 2-D TPU layout."""
    prepped = []
    for (w, b) in params:
        prepped.append((w.astype(jnp.bfloat16),
                        b.reshape(1, -1).astype(jnp.float32)))
    return prepped


def decoder_forward(x, prepped_params):
    """x: (B, 3) float32; prepped_params: output of prepare_params()."""
    B, F = x.shape

    # Choose the batch tiling: rows padded to a multiple of 8 (f32 sublanes);
    # at least 2 grid steps when the batch allows it so v7x's two TensorCores
    # both get work; tile capped at M_TILE_MAX.
    b8 = _round_up(B, 8)
    n_tiles = max(pl.cdiv(b8, M_TILE_MAX), 2 if b8 >= 16 else 1)
    m_tile = _round_up(pl.cdiv(b8, n_tiles), 8)
    b_pad = m_tile * n_tiles
    if b_pad != B:
        x = jnp.pad(x, ((0, b_pad - B), (0, 0)))

    grid = (n_tiles,)

    # x / out move with the grid; weights & biases keep constant block indices
    # so they stay VMEM-resident (fetched once) across all grid steps.
    # (pipeline_mode=pl.Buffered(1) on the constant specs would shave ~0.5 MiB
    #  of VMEM; omitted — headroom is ample on every generation.)
    args = [x]
    in_specs = [pl.BlockSpec((m_tile, F), lambda i: (i, 0))]
    for (w, b2d) in prepped_params:
        args.extend([w, b2d])
        in_specs.append(pl.BlockSpec(w.shape, lambda i: (0, 0)))
        in_specs.append(pl.BlockSpec(b2d.shape, lambda i: (0, 0)))

    out = pl.pallas_call(
        decoder_kernel,
        out_shape=jax.ShapeDtypeStruct((b_pad, OUT_DIM), jnp.float32),
        grid=grid,
        in_specs=in_specs,
        # 784 == full output array dim, so the (8,128) block rule is satisfied.
        out_specs=pl.BlockSpec((m_tile, OUT_DIM), lambda i: (i, 0)),
        compiler_params=pltpu.CompilerParams(
            dimension_semantics=("parallel",)),  # 2-TC split on v7x; no-op v5e/v6e
    )(*args)

    # Drop batch padding only if any was added (no column slice anymore).
    if b_pad != B:
        out = out[:B]
    return out


def init_decoder_params(key):
    """Deterministic init mimicking PyTorch nn.Linear defaults
    (uniform(-1/sqrt(fan_in), 1/sqrt(fan_in)) for both W and b)."""
    dims = [(3, 12), (12, 64), (64, 128), (128, 28 * 28)]
    params = []
    for (fan_in, fan_out) in dims:
        key, kw, kb = jax.random.split(key, 3)
        bound = 1.0 / jnp.sqrt(jnp.float32(fan_in))
        w = jax.random.uniform(kw, (fan_in, fan_out), jnp.float32, -bound, bound)
        b = jax.random.uniform(kb, (fan_out,), jnp.float32, -bound, bound)
        params.append((w, b))
    return params


def reference_forward(x, prepped_params):
    """Pure-JAX reference using the same bf16 weights / bf16 activations with
    f32 accumulation, so the comparison isolates kernel correctness rather than
    dtype rounding."""
    h = x
    n = len(prepped_params)
    for i, (w, b2d) in enumerate(prepped_params):
        h = jnp.dot(h.astype(jnp.bfloat16), w,
                    preferred_element_type=jnp.float32) + b2d
        if i < n - 1:
            h = jnp.maximum(h, 0.0)
    return h


if __name__ == "__main__":
    key = jax.random.PRNGKey(0)
    key, kx1, kx2 = jax.random.split(key, 3)

    params = init_decoder_params(key)
    prepped = prepare_params(params)

    # Small micro-batch of latent codes (dim 3): single-tile path.
    B = 8
    x = jax.random.normal(kx1, (B, 3), jnp.float32)
    out = jax.block_until_ready(decoder_forward(x, prepped))
    ref = reference_forward(x, prepped)
    assert out.shape == (B, OUT_DIM), out.shape
    assert jnp.allclose(out, ref, atol=1e-3, rtol=1e-3), "mismatch vs reference (B=8)"

    # Larger, non-multiple batch: exercises the multi-step grid (>=2 tiles for
    # v7x megacore) and batch-row padding/slicing.
    B2 = 1029
    x2 = jax.random.normal(kx2, (B2, 3), jnp.float32)
    out2 = jax.block_until_ready(decoder_forward(x2, prepped))
    ref2 = reference_forward(x2, prepped)
    assert out2.shape == (B2, OUT_DIM), out2.shape
    assert jnp.allclose(out2, ref2, atol=1e-3, rtol=1e-3), "mismatch vs reference (B=1029)"

    print("KERNEL_OK")
</pallas_src>

<mosaic_0001>
module attributes {stable_mosaic.version = 11 : i64} {
  func.func @decoder_kernel(%arg0: i32, %arg1: memref<8x3xf32, #tpu.memory_space<vmem>>, %arg2: memref<3x12xbf16, #tpu.memory_space<vmem>>, %arg3: memref<1x12xf32, #tpu.memory_space<vmem>>, %arg4: memref<12x64xbf16, #tpu.memory_space<vmem>>, %arg5: memref<1x64xf32, #tpu.memory_space<vmem>>, %arg6: memref<64x128xbf16, #tpu.memory_space<vmem>>, %arg7: memref<1x128xf32, #tpu.memory_space<vmem>>, %arg8: memref<128x784xbf16, #tpu.memory_space<vmem>>, %arg9: memref<1x784xf32, #tpu.memory_space<vmem>>, %arg10: memref<8x784xf32, #tpu.memory_space<vmem>>) attributes {dimension_semantics = [#tpu.dimension_semantics<parallel>], iteration_bounds = array<i64: 1>, scalar_prefetch = 0 : i64, scratch_operands = 0 : i64, tpu.core_type = #tpu.core_type<tc>, window_params = [{transform_indices = @transform_0, window_bounds = array<i64: 8, 3>}, {pipeline_mode = #tpu.pipeline_mode<synchronous>, transform_indices = @transform_1, window_bounds = array<i64: 3, 12>}, {pipeline_mode = #tpu.pipeline_mode<synchronous>, transform_indices = @transform_2, window_bounds = array<i64: 1, 12>}, {pipeline_mode = #tpu.pipeline_mode<synchronous>, transform_indices = @transform_3, window_bounds = array<i64: 12, 64>}, {pipeline_mode = #tpu.pipeline_mode<synchronous>, transform_indices = @transform_4, window_bounds = array<i64: 1, 64>}, {pipeline_mode = #tpu.pipeline_mode<synchronous>, transform_indices = @transform_5, window_bounds = array<i64: 64, 128>}, {pipeline_mode = #tpu.pipeline_mode<synchronous>, transform_indices = @transform_6, window_bounds = array<i64: 1, 128>}, {pipeline_mode = #tpu.pipeline_mode<synchronous>, transform_indices = @transform_7, window_bounds = array<i64: 128, 784>}, {pipeline_mode = #tpu.pipeline_mode<synchronous>, transform_indices = @transform_8, window_bounds = array<i64: 1, 784>}, {transform_indices = @transform_9, window_bounds = array<i64: 8, 784>}]} {
    %c0 = arith.constant 0 : index
    %c0_0 = arith.constant 0 : index
    %0 = vector.load %arg1[%c0, %c0_0] : memref<8x3xf32, #tpu.memory_space<vmem>>, vector<8x3xf32>
    %1 = arith.truncf %0 : vector<8x3xf32> to vector<8x3xbf16>
    %c0_1 = arith.constant 0 : index
    %c0_2 = arith.constant 0 : index
    %2 = vector.load %arg2[%c0_1, %c0_2] : memref<3x12xbf16, #tpu.memory_space<vmem>>, vector<3x12xbf16>
    %cst = arith.constant dense<0.000000e+00> : vector<8x12xf32>
    %3 = tpu.matmul %1, %2, %cst {dimension_numbers = #tpu.dot_dimension_numbers<[1], [0], [0], [1], [0, 0, 1, 1], [], []>} : vector<8x3xbf16>, vector<3x12xbf16>, vector<8x12xf32> -> vector<8x12xf32>
    %c0_3 = arith.constant 0 : index
    %c0_4 = arith.constant 0 : index
    %4 = vector.load %arg3[%c0_3, %c0_4] : memref<1x12xf32, #tpu.memory_space<vmem>>, vector<1x12xf32>
    %5 = vector.broadcast %4 : vector<1x12xf32> to vector<8x12xf32>
    %6 = arith.addf %3, %5 : vector<8x12xf32>
    %cst_5 = arith.constant 0.000000e+00 : f32
    %7 = vector.broadcast %cst_5 : f32 to vector<8x12xf32>
    %8 = arith.maximumf %6, %7 : vector<8x12xf32>
    %9 = arith.truncf %8 : vector<8x12xf32> to vector<8x12xbf16>
    %c0_6 = arith.constant 0 : index
    %c0_7 = arith.constant 0 : index
    %10 = vector.load %arg4[%c0_6, %c0_7] : memref<12x64xbf16, #tpu.memory_space<vmem>>, vector<12x64xbf16>
    %cst_8 = arith.constant dense<0.000000e+00> : vector<8x64xf32>
    %11 = tpu.matmul %9, %10, %cst_8 {dimension_numbers = #tpu.dot_dimension_numbers<[1], [0], [0], [1], [0, 0, 1, 1], [], []>} : vector<8x12xbf16>, vector<12x64xbf16>, vector<8x64xf32> -> vector<8x64xf32>
    %c0_9 = arith.constant 0 : index
    %c0_10 = arith.constant 0 : index
    %12 = vector.load %arg5[%c0_9, %c0_10] : memref<1x64xf32, #tpu.memory_space<vmem>>, vector<1x64xf32>
    %13 = vector.broadcast %12 : vector<1x64xf32> to vector<8x64xf32>
    %14 = arith.addf %11, %13 : vector<8x64xf32>
    %cst_11 = arith.constant 0.000000e+00 : f32
    %15 = vector.broadcast %cst_11 : f32 to vector<8x64xf32>
    %16 = arith.maximumf %14, %15 : vector<8x64xf32>
    %17 = arith.truncf %16 : vector<8x64xf32> to vector<8x64xbf16>
    %c0_12 = arith.constant 0 : index
    %c0_13 = arith.constant 0 : index
    %18 = vector.load %arg6[%c0_12, %c0_13] : memref<64x128xbf16, #tpu.memory_space<vmem>>, vector<64x128xbf16>
    %cst_14 = arith.constant dense<0.000000e+00> : vector<8x128xf32>
    %19 = tpu.matmul %17, %18, %cst_14 {dimension_numbers = #tpu.dot_dimension_numbers<[1], [0], [0], [1], [0, 0, 1, 1], [], []>} : vector<8x64xbf16>, vector<64x128xbf16>, vector<8x128xf32> -> vector<8x128xf32>
    %c0_15 = arith.constant 0 : index
    %c0_16 = arith.constant 0 : index
    %20 = vector.load %arg7[%c0_15, %c0_16] : memref<1x128xf32, #tpu.memory_space<vmem>>, vector<1x128xf32>
    %21 = vector.broadcast %20 : vector<1x128xf32> to vector<8x128xf32>
    %22 = arith.addf %19, %21 : vector<8x128xf32>
    %cst_17 = arith.constant 0.000000e+00 : f32
    %23 = vector.broadcast %cst_17 : f32 to vector<8x128xf32>
    %24 = arith.maximumf %22, %23 : vector<8x128xf32>
    %25 = arith.truncf %24 : vector<8x128xf32> to vector<8x128xbf16>
    %c0_18 = arith.constant 0 : index
    %c0_19 = arith.constant 0 : index
    %26 = vector.load %arg8[%c0_18, %c0_19] : memref<128x784xbf16, #tpu.memory_space<vmem>>, vector<128x784xbf16>
    %cst_20 = arith.constant dense<0.000000e+00> : vector<8x784xf32>
    %27 = tpu.matmul %25, %26, %cst_20 {dimension_numbers = #tpu.dot_dimension_numbers<[1], [0], [0], [1], [0, 0, 1, 1], [], []>} : vector<8x128xbf16>, vector<128x784xbf16>, vector<8x784xf32> -> vector<8x784xf32>
    %c0_21 = arith.constant 0 : index
    %c0_22 = arith.constant 0 : index
    %28 = vector.load %arg9[%c0_21, %c0_22] : memref<1x784xf32, #tpu.memory_space<vmem>>, vector<1x784xf32>
    %29 = vector.broadcast %28 : vector<1x784xf32> to vector<8x784xf32>
    %30 = arith.addf %27, %29 : vector<8x784xf32>
    %c0_23 = arith.constant 0 : index
    %c0_24 = arith.constant 0 : index
    %31 = vector.load %arg10[%c0_23, %c0_24] : memref<8x784xf32, #tpu.memory_space<vmem>>, vector<8x784xf32>
    tpu.vector_store %arg10[%c0_23, %c0_24], %30 {strides = array<i32>} : memref<8x784xf32, #tpu.memory_space<vmem>>, vector<8x784xf32>,
    return
  }
  func.func @transform_0(%arg0: i32) -> (i32, i32) {
    %c0_i32 = arith.constant 0 : i32
    %c0_i32_0 = arith.constant 0 : i32
    return %arg0, %c0_i32 : i32, i32
  }
  func.func @transform_1(%arg0: i32) -> (i32, i32) {
    %c0_i32 = arith.constant 0 : i32
    %c0_i32_0 = arith.constant 0 : i32
    %c0_i32_1 = arith.constant 0 : i32
    return %c0_i32, %c0_i32_0 : i32, i32
  }
  func.func @transform_2(%arg0: i32) -> (i32, i32) {
    %c0_i32 = arith.constant 0 : i32
    %c0_i32_0 = arith.constant 0 : i32
    %c0_i32_1 = arith.constant 0 : i32
    return %c0_i32, %c0_i32_0 : i32, i32
  }
  func.func @transform_3(%arg0: i32) -> (i32, i32) {
    %c0_i32 = arith.constant 0 : i32
    %c0_i32_0 = arith.constant 0 : i32
    %c0_i32_1 = arith.constant 0 : i32
    return %c0_i32, %c0_i32_0 : i32, i32
  }
  func.func @transform_4(%arg0: i32) -> (i32, i32) {
    %c0_i32 = arith.constant 0 : i32
    %c0_i32_0 = arith.constant 0 : i32
    %c0_i32_1 = arith.constant 0 : i32
    return %c0_i32, %c0_i32_0 : i32, i32
  }
  func.func @transform_5(%arg0: i32) -> (i32, i32) {
    %c0_i32 = arith.constant 0 : i32
    %c0_i32_0 = arith.constant 0 : i32
    %c0_i32_1 = arith.constant 0 : i32
    return %c0_i32, %c0_i32_0 : i32, i32
  }
  func.func @transform_6(%arg0: i32) -> (i32, i32) {
    %c0_i32 = arith.constant 0 : i32
    %c0_i32_0 = arith.constant 0 : i32
    %c0_i32_1 = arith.constant 0 : i32
    return %c0_i32, %c0_i32_0 : i32, i32
  }
  func.func @transform_7(%arg0: i32) -> (i32, i32) {
    %c0_i32 = arith.constant 0 : i32
    %c0_i32_0 = arith.constant 0 : i32
    %c0_i32_1 = arith.constant 0 : i32
    return %c0_i32, %c0_i32_0 : i32, i32
  }
  func.func @transform_8(%arg0: i32) -> (i32, i32) {
    %c0_i32 = arith.constant 0 : i32
    %c0_i32_0 = arith.constant 0 : i32
    %c0_i32_1 = arith.constant 0 : i32
    return %c0_i32, %c0_i32_0 : i32, i32
  }
  func.func @transform_9(%arg0: i32) -> (i32, i32) {
    %c0_i32 = arith.constant 0 : i32
    %c0_i32_0 = arith.constant 0 : i32
    return %arg0, %c0_i32 : i32, i32
  }
}

</mosaic_0001>

<bundles_post_ra>
// kernel: tpu_custom_call.1
= control target key start
LH: loop header
LB: loop body
LE: loop exit
PB: predicated region body
PF: predicated region fallthrough
CT: control target
= control target key end

     0   :  { %vm45_vm0 = vcmask 1040384   ;;  %vm46_vm1 = vcmask 1041408   ;;  %v978_v1 = vmov 65535   ;;  %s1405_s0 = inlined_call_operand.vmem [shape: f32[8,3], index: 0, kind: input, shape index: {}]   ;;  %s1406_s1 = inlined_call_operand.vmem [shape: bf16[3,12], index: 1, kind: input, shape index: {}]   ;;  %s1407_s2 = inlined_call_operand.vmem [shape: f32[1,12], index: 2, kind: input, shape index: {}]   ;;  %s1408_s3 = inlined_call_operand.vmem [shape: bf16[12,64], index: 3, kind: input, shape index: {}]   ;;  %s1409_s4 = inlined_call_operand.vmem [shape: f32[1,64], index: 4, kind: input, shape index: {}]   ;;  %s1410_s5 = inlined_call_operand.vmem [shape: bf16[64,128], index: 5, kind: input, shape index: {}]   ;;  %s1411_s6 = inlined_call_operand.vmem [shape: f32[1,128], index: 6, kind: input, shape index: {}]   ;;  %s1412_s7 = inlined_call_operand.vmem [shape: bf16[128,784], index: 7, kind: input, shape index: {}]   ;;  %s1413_s8 = inlined_call_operand.vmem [shape: f32[1,784], index: 8, kind: input, shape index: {}]   ;;  %s1414_s9 = inlined_call_operand.hbm [shape: f32[8,784], index: 9, kind: output, shape index: {}]  }
   0x1   :  { %v36_v0 = vld [vmem:[%s1406_s1] sm:$0x3]  ;;  %v47_v2 = vsel %vm45_vm0, 4294967295, %v978_v1 }
   0x2   :  { %v34_v3 = vld [vmem:[%s1405_s0] sm:$0xff]  ;;  %v48_v4 = vsel %vm46_vm1, %v47_v2, 0 }
   0x3   :  { %v50_v5 = vand.u32 %v48_v4, %v36_v0 }
   0x4   :  { %14 = vsyncpa [#allocation3], 0  ;;  %v35_v6 = vpack.c.bf16 %v34_v3, %v34_v3  ;;  %vm41_vm2 = vcmask 23552   ;;  %v642_v7 = vld [vmem:[%s1408_s3] sm:$0xf]  ;;  %vm82_vm3 = vcmask 1045504  }
   0x5   :  { %59 = vmatpush.bf16.msra.mxu2 %v50_v5  ;;  %v886_v8 = vld [vmem:[%s1408_s3] sm:$0x30]  ;;  %v890_v11 = vld [vmem:[%s1410_s5 + $0x18] sm:$0xff]  ;;  %v889_v12 = vld [vmem:[%s1410_s5 + $0x10] sm:$0xff]  ;;  %vm78_vm4 = vcmask 97280   ;;  %vm137_vm5 = vcmask 523264  }
   0x6   :  { %v643_v9 = vor.u32 %v886_v8, %v642_v7  ;;  %v888_v13 = vld [vmem:[%s1410_s5 + $0x8] sm:$0xff]  ;;  %v949_v14 = vld [vmem:[%s1407_s2] ss:$0 sm:$0xff]  ;;  %v943_v22 = vld [vmem:[%s1412_s7 + $0x1a0] sm:$0xf0]  ;;  %vm621_vm6 = vcmask 130048  }
   0x7   :  { %v887_v20 = vld [vmem:[%s1410_s5] sm:$0xff]  ;;  %v860_v21 = vld [vmem:[%s1412_s7 + $0x188] sm:$0xf]  ;;  %v940_v23 = vld [vmem:[%s1412_s7 + $0x18c] sm:$0xf] }
   0x8   :  { %639 = vmatmul.msk.bf16.vlgmr.msra.gmra.mxu2 %vm41_vm2, %v35_v6  ;;  %v84_v10 = vsel %vm82_vm3, %v643_v9, 0  ;;  %v861_v24 = vor.u32 %v943_v22, %v860_v21  ;;  %v862_v25 = vld [vmem:[%s1412_s7 + $0x1a4] sm:$0xf0]  ;;  %v868_v26 = vld [vmem:[%s1412_s7 + $0x190] sm:$0xf] }
   0x9   :  { %93 = vmatpush.bf16.msra.mxu1 %v84_v10  ;;  %145 = vmatpush.bf16.msrb.mxu2 %v890_v11  ;;  %v944_v27 = vld [vmem:[%s1412_s7 + $0x1a8] sm:$0xf0]  ;;  %v865_v28 = vor.u32 %v940_v23, %v862_v25  ;;  %v832_v30 = vld [vmem:[%s1412_s7 + $0x150] sm:$0xf]  ;;  %v933_v32 = vld [vmem:[%s1412_s7 + $0x154] sm:$0xf] }
   0xa   :  { %v869_v29 = vor.u32 %v944_v27, %v868_v26  ;;  %v936_v31 = vld [vmem:[%s1412_s7 + $0x168] sm:$0xf0]  ;;  %524 = vmatpush.bf16.msra.mxu3 %v861_v24  ;;  %v834_v34 = vld [vmem:[%s1412_s7 + $0x16c] sm:$0xf0]  ;;  %v840_v35 = vld [vmem:[%s1412_s7 + $0x158] sm:$0xf] }
   0xb   :  { %v833_v33 = vor.u32 %v936_v31, %v832_v30  ;;  %v937_v36 = vld [vmem:[%s1412_s7 + $0x170] sm:$0xf0]  ;;  %537 = vmatpush.bf16.msra.mxu0 %v865_v28  ;;  %v837_v37 = vor.u32 %v933_v32, %v834_v34  ;;  %v804_v39 = vld [vmem:[%s1412_s7 + $0x118] sm:$0xf]  ;;  %v926_v41 = vld [vmem:[%s1412_s7 + $0x11c] sm:$0xf] }
   0xc   :  { %v841_v38 = vor.u32 %v937_v36, %v840_v35  ;;  %v929_v40 = vld [vmem:[%s1412_s7 + $0x130] sm:$0xf0]  ;;  %v806_v42 = vld [vmem:[%s1412_s7 + $0x134] sm:$0xf0]  ;;  %v812_v43 = vld [vmem:[%s1412_s7 + $0x120] sm:$0xf] }
   0xd   :  { %146 = vmatpush.bf16.msrb.mxu2 %v889_v12  ;;  %550 = vmatpush.bf16.msrb.mxu1 %v869_v29  ;;  %v930_v44 = vld [vmem:[%s1412_s7 + $0x138] sm:$0xf0]  ;;  %v805_v45 = vor.u32 %v929_v40, %v804_v39  ;;  %v776_v46 = vld [vmem:[%s1412_s7 + $0xe0] sm:$0xf]  ;;  %v809_v48 = vor.u32 %v926_v41, %v806_v42  ;;  %v919_v50 = vld [vmem:[%s1412_s7 + $0xe4] sm:$0xf] }
   0xe   :  { %525 = vmatpush.bf16.msra.mxu3 %v833_v33  ;;  %v922_v47 = vld [vmem:[%s1412_s7 + $0xf8] sm:$0xf0]  ;;  %v813_v49 = vor.u32 %v930_v44, %v812_v43  ;;  %v941_v51 = vld [vmem:[%s1412_s7 + $0x194] sm:$0xf]  ;;  %v870_v52 = vld [vmem:[%s1412_s7 + $0x1ac] sm:$0xf0] }
   0xf   :  { %538 = vmatpush.bf16.msra.mxu0 %v837_v37  ;;  %v778_v53 = vld [vmem:[%s1412_s7 + $0xfc] sm:$0xf0]  ;;  %v784_v54 = vld [vmem:[%s1412_s7 + $0xe8] sm:$0xf]  ;;  %v923_v55 = vld [vmem:[%s1412_s7 + $0x100] sm:$0xf0]  ;;  %v873_v56 = vor.u32 %v941_v51, %v870_v52  ;;  %v777_v58 = vor.u32 %v922_v47, %v776_v46 }
  0x10   :  { %v934_v57 = vld [vmem:[%s1412_s7 + $0x15c] sm:$0xf]  ;;  %v748_v59 = vld [vmem:[%s1412_s7 + $0xa8] sm:$0xf]  ;;  %v915_v60 = vld [vmem:[%s1412_s7 + $0xc0] sm:$0xf0]  ;;  %v781_v62 = vor.u32 %v919_v50, %v778_v53  ;;  %v785_v63 = vor.u32 %v923_v55, %v784_v54 }
  0x11   :  { %147 = vmatpush.bf16.msrb.mxu2 %v888_v13  ;;  %551 = vmatpush.bf16.msrb.mxu1 %v841_v38  ;;  %v842_v61 = vld [vmem:[%s1412_s7 + $0x174] sm:$0xf0]  ;;  %v912_v0 = vld [vmem:[%s1412_s7 + $0xac] sm:$0xf]  ;;  %v750_v1 = vld [vmem:[%s1412_s7 + $0xc4] sm:$0xf0]  ;;  %v749_v7 = vor.u32 %v915_v60, %v748_v59 }
  0x12   :  { %526 = vmatpush.bf16.msra.mxu3 %v805_v45  ;;  %v756_v2 = vld [vmem:[%s1412_s7 + $0xb0] sm:$0xf]  ;;  %v845_v3 = vor.u32 %v934_v57, %v842_v61  ;;  %v916_v4 = vld [vmem:[%s1412_s7 + $0xc8] sm:$0xf0]  ;;  %v927_v5 = vld [vmem:[%s1412_s7 + $0x124] sm:$0xf]  ;;  %v753_v11 = vor.u32 %v912_v0, %v750_v1 }
  0x13   :  { %539 = vmatpush.bf16.msra.mxu0 %v809_v48  ;;  %v814_v6 = vld [vmem:[%s1412_s7 + $0x13c] sm:$0xf0]  ;;  %v720_v8 = vld [vmem:[%s1412_s7 + $0x70] sm:$0xf]  ;;  %v908_v9 = vld [vmem:[%s1412_s7 + $0x88] sm:$0xf0]  ;;  %v757_v12 = vor.u32 %v916_v4, %v756_v2 }
  0x14   :  { %v817_v10 = vor.u32 %v927_v5, %v814_v6  ;;  %v905_v13 = vld [vmem:[%s1412_s7 + $0x74] sm:$0xf]  ;;  %v692_v21 = vld [vmem:[%s1412_s7 + $0x38] sm:$0xf]  ;;  %v898_v26 = vld [vmem:[%s1412_s7 + $0x3c] sm:$0xf] }
  0x15   :  { %148 = vmatpush.bf16.msrb.mxu2 %v887_v20  ;;  %552 = vmatpush.bf16.msrb.mxu1 %v813_v49  ;;  %v721_v20 = vor.u32 %v908_v9, %v720_v8  ;;  %v901_v22 = vld [vmem:[%s1412_s7 + $0x50] sm:$0xf0]  ;;  %v758_v28 = vld [vmem:[%s1412_s7 + $0xcc] sm:$0xf0]  ;;  %v694_v29 = vld [vmem:[%s1412_s7 + $0x54] sm:$0xf0] }
  0x16   :  { %527 = vmatpush.bf16.msra.mxu3 %v777_v58  ;;  %v913_v27 = vld [vmem:[%s1412_s7 + $0xb4] sm:$0xf]  ;;  %v700_v30 = vld [vmem:[%s1412_s7 + $0x40] sm:$0xf]  ;;  %v902_v31 = vld [vmem:[%s1412_s7 + $0x58] sm:$0xf0]  ;;  %v693_v32 = vor.u32 %v901_v22, %v692_v21  ;;  %v697_v38 = vor.u32 %v898_v26, %v694_v29 }
  0x17   :  { %540 = vmatpush.bf16.msra.mxu0 %v781_v62  ;;  %v664_v33 = vld [vmem:[%s1412_s7] sm:$0xf]  ;;  %v894_v34 = vld [vmem:[%s1412_s7 + $0x18] sm:$0xf0]  ;;  %v891_v35 = vld [vmem:[%s1412_s7 + $0x4] sm:$0xf]  ;;  %v761_v36 = vor.u32 %v913_v27, %v758_v28  ;;  %v701_v39 = vor.u32 %v902_v31, %v700_v30 }
  0x18   :  { %v666_v40 = vld [vmem:[%s1412_s7 + $0x1c] sm:$0xf0]  ;;  %v672_v41 = vld [vmem:[%s1412_s7 + $0x8] sm:$0xf]  ;;  %v895_v42 = vld [vmem:[%s1412_s7 + $0x20] sm:$0xf0]  ;;  %v665_v51 = vor.u32 %v894_v34, %v664_v33 }
  0x19   :  { %563 = vmatpush.bf16.msra.mxu2 %v873_v56  ;;  %553 = vmatpush.bf16.msrb.mxu1 %v785_v63  ;;  %v876_v44 = vld [vmem:[%s1412_s7 + $0x198] sm:$0xf]  ;;  %v945_v45 = vld [vmem:[%s1412_s7 + $0x1b0] sm:$0xf0]  ;;  %v942_v46 = vld [vmem:[%s1412_s7 + $0x19c] sm:$0xf]  ;;  %v669_v54 = vor.u32 %v891_v35, %v666_v40  ;;  %v673_v55 = vor.u32 %v895_v42, %v672_v41 }
  0x1a   :  { %528 = vmatpush.bf16.msra.mxu3 %v749_v7  ;;  %v878_v47 = vld [vmem:[%s1412_s7 + $0x1b4] sm:$0xf0]  ;;  %v884_v48 = vld [vmem:[%s1412_s7 + $0x1a0] sm:$0xf]  ;;  %v946_v49 = vld [vmem:[%s1412_s7 + $0x1b8] sm:$0xf0]  ;;  %v877_v57 = vor.u32 %v945_v45, %v876_v44 }
  0x1b   :  { %541 = vmatpush.bf16.msra.mxu0 %v753_v11  ;;  %v906_v52 = vld [vmem:[%s1412_s7 + $0x7c] sm:$0xf]  ;;  %v730_v53 = vld [vmem:[%s1412_s7 + $0x94] sm:$0xf0]  ;;  %v881_v58 = vor.u32 %v942_v46, %v878_v47  ;;  %v848_v59 = vld [vmem:[%s1412_s7 + $0x160] sm:$0xf]  ;;  %v885_v60 = vor.u32 %v946_v49, %v884_v48 }
  0x1c   :  { %v733_v61 = vor.u32 %v906_v52, %v730_v53  ;;  %v938_v62 = vld [vmem:[%s1412_s7 + $0x178] sm:$0xf0]  ;;  %v935_v63 = vld [vmem:[%s1412_s7 + $0x164] sm:$0xf]  ;;  %v850_v0 = vld [vmem:[%s1412_s7 + $0x17c] sm:$0xf0] }
  0x1d   :  { %564 = vmatpush.bf16.msra.mxu2 %v845_v3  ;;  %554 = vmatpush.bf16.msrb.mxu1 %v757_v12  ;;  %v856_v1 = vld [vmem:[%s1412_s7 + $0x168] sm:$0xf]  ;;  %v939_v2 = vld [vmem:[%s1412_s7 + $0x180] sm:$0xf0]  ;;  %v849_v4 = vor.u32 %v938_v62, %v848_v59  ;;  %v853_v5 = vor.u32 %v935_v63, %v850_v0  ;;  %v702_v8 = vld [vmem:[%s1412_s7 + $0x5c] sm:$0xf0] }
  0x1e   :  { %529 = vmatpush.bf16.msra.mxu3 %v721_v20  ;;  %v857_v6 = vor.u32 %v939_v2, %v856_v1  ;;  %v899_v7 = vld [vmem:[%s1412_s7 + $0x44] sm:$0xf]  ;;  %v820_v9 = vld [vmem:[%s1412_s7 + $0x128] sm:$0xf]  ;;  %v928_v12 = vld [vmem:[%s1412_s7 + $0x12c] sm:$0xf] }
  0x1f   :  { %v931_v11 = vld [vmem:[%s1412_s7 + $0x140] sm:$0xf0]  ;;  %v674_v20 = vld [vmem:[%s1412_s7 + $0x24] sm:$0xf0]  ;;  %v792_v21 = vld [vmem:[%s1412_s7 + $0xf0] sm:$0xf] }
  0x20   :  { %v800_v28 = vld [vmem:[%s1412_s7 + $0xf8] sm:$0xf]  ;;  %v925_v29 = vld [vmem:[%s1412_s7 + $0x110] sm:$0xf0]  ;;  %v914_v33 = vld [vmem:[%s1412_s7 + $0xbc] sm:$0xf] }
  0x21   :  { %565 = vmatpush.bf16.msra.mxu2 %v817_v10  ;;  %v705_v10 = vor.u32 %v899_v7, %v702_v8  ;;  %v801_v30 = vor.u32 %v925_v29, %v800_v28  ;;  %v764_v31 = vld [vmem:[%s1412_s7 + $0xb8] sm:$0xf]  ;;  %v736_v40 = vld [vmem:[%s1412_s7 + $0x80] sm:$0xf]  ;;  %v910_v41 = vld [vmem:[%s1412_s7 + $0x98] sm:$0xf0] }
  0x22   :  { %530 = vmatpush.bf16.msra.mxu3 %v693_v32  ;;  %v917_v32 = vld [vmem:[%s1412_s7 + $0xd0] sm:$0xf0]  ;;  %v766_v35 = vld [vmem:[%s1412_s7 + $0xd4] sm:$0xf0]  ;;  %v907_v42 = vld [vmem:[%s1412_s7 + $0x84] sm:$0xf] }
  0x23   :  { %v765_v34 = vor.u32 %v917_v32, %v764_v31  ;;  %v738_v44 = vld [vmem:[%s1412_s7 + $0x9c] sm:$0xf0]  ;;  %v744_v45 = vld [vmem:[%s1412_s7 + $0x88] sm:$0xf]  ;;  %v911_v46 = vld [vmem:[%s1412_s7 + $0xa0] sm:$0xf0] }
  0x24   :  { %v741_v47 = vor.u32 %v907_v42, %v738_v44  ;;  %v745_v48 = vor.u32 %v911_v46, %v744_v45  ;;  %v708_v49 = vld [vmem:[%s1412_s7 + $0x48] sm:$0xf]  ;;  %v716_v53 = vld [vmem:[%s1412_s7 + $0x50] sm:$0xf]  ;;  %v896_v59 = vld [vmem:[%s1412_s7 + $0x28] sm:$0xf0] }
  0x25   :  { %v710_v52 = vld [vmem:[%s1412_s7 + $0x64] sm:$0xf0]  ;;  %v688_v62 = vld [vmem:[%s1412_s7 + $0x18] sm:$0xf]  ;;  %v897_v63 = vld [vmem:[%s1412_s7 + $0x30] sm:$0xf0] }
  0x26   :  { %531 = vmatpush.bf16.msra.mxu3 %v665_v51  ;;  %v900_v51 = vld [vmem:[%s1412_s7 + $0x4c] sm:$0xf]  ;;  %v689_v2 = vor.u32 %v897_v63, %v688_v62 }
  0x2a   :  { %576 = vmatpush.bf16.msrb.mxu3 %v877_v57 }
  0x2e   :  { %577 = vmatpush.bf16.msrb.mxu3 %v849_v4 }
  0x8b   :  { %v61_v15 = vpop.f32.mrf.mxu2 }
  0x8c   :  { %v62_v16 = vadd.f32 %v949_v14, %v61_v15  ;;  %v920_v14 = vld [vmem:[%s1412_s7 + $0xec] sm:$0xf]  ;;  %v786_v15 = vld [vmem:[%s1412_s7 + $0x104] sm:$0xf0] }
  0x8d   :  { %v789_v23 = vor.u32 %v920_v14, %v786_v15  ;;  %v821_v14 = vor.u32 %v931_v11, %v820_v9  ;;  %v220_v9 = vld [vmem:[%s1413_s8] sm:$0x7f] }
  0x8e   :  { %v65_v17 = vmax.f32 %v62_v16, 0.0  ;;  %v722_v16 = vld [vmem:[%s1412_s7 + $0x8c] sm:$0xf0]  ;;  %v224_v11 = vperm.slane %v220_v9, 2  ;;  %v226_v32 = vperm.slane %v220_v9, 4 }
  0x8f   :  { %v725_v24 = vor.u32 %v905_v13, %v722_v16  ;;  %566 = vmatpush.bf16.msra.mxu2 %v789_v23  ;;  %v822_v13 = vld [vmem:[%s1412_s7 + $0x144] sm:$0xf0]  ;;  %v828_v16 = vld [vmem:[%s1412_s7 + $0x130] sm:$0xf]  ;;  %578 = vmatpush.bf16.msrb.mxu3 %v821_v14  ;;  %v924_v23 = vld [vmem:[%s1412_s7 + $0x108] sm:$0xf0] }
  0x90   :  { %v66_v18 = vpack.c.bf16 %v65_v17, %v65_v17  ;;  %v728_v17 = vld [vmem:[%s1412_s7 + $0x78] sm:$0xf]  ;;  %v825_v15 = vor.u32 %v928_v12, %v822_v13  ;;  %v793_v26 = vor.u32 %v924_v23, %v792_v21 }
  0x91   :  { %542 = vmatpush.bf16.msra.mxu0 %v725_v24  ;;  %v921_v24 = vld [vmem:[%s1412_s7 + $0xf4] sm:$0xf] }
  0x92   :  { %644 = vmatmul.msk.bf16.vlgmr.msra.gmra.mxu1 %vm78_vm4, %v66_v18  ;;  %v909_v18 = vld [vmem:[%s1412_s7 + $0x90] sm:$0xf0] }
  0x93   :  { %v63_v19 = vpop.f32.mrf.mxu2  ;;  %v729_v25 = vor.u32 %v909_v18, %v728_v17  ;;  %567 = vmatpush.bf16.msra.mxu2 %v761_v36  ;;  %v932_v17 = vld [vmem:[%s1412_s7 + $0x148] sm:$0xf0]  ;;  %579 = vmatpush.bf16.msrb.mxu3 %v793_v26  ;;  %v772_v36 = vld [vmem:[%s1412_s7 + $0xc0] sm:$0xf]  ;;  %v228_v26 = vperm.slane %v220_v9, 6 }
  0x94   :  { %v950_v19 = vld [vmem:[%s1409_s4] ss:$0 sm:$0xff]  ;;  %v829_v18 = vor.u32 %v932_v17, %v828_v16  ;;  %v222_v16 = vperm.slane %v220_v9, 0  ;;  %v225_v17 = vperm.slane %v220_v9, 3  ;;  %s630_s4 = sshll.u32 %s1414_s9, 4  ;;  %s631_s4 = int_to_ptr.hbm [resolvable:$true] %s630_s4 }
  0x95   :  { %555 = vmatpush.bf16.msrb.mxu1 %v729_v25  ;;  %543 = vmatpush.bf16.msra.mxu0 %v697_v38  ;;  %v794_v25 = vld [vmem:[%s1412_s7 + $0x10c] sm:$0xf0]  ;;  %v769_v38 = vor.u32 %v914_v33, %v766_v35 }
  0x96   :  { %v797_v27 = vor.u32 %v921_v24, %v794_v25  ;;  %v227_v24 = vperm.slane %v220_v9, 5 }
  0x97   :  { %568 = vmatpush.bf16.msra.mxu2 %v733_v61  ;;  %580 = vmatpush.bf16.msrb.mxu3 %v765_v34  ;;  %v682_v61 = vld [vmem:[%s1412_s7 + $0x2c] sm:$0xf0] }
  0x99   :  { %556 = vmatpush.bf16.msrb.mxu1 %v701_v39  ;;  %544 = vmatpush.bf16.msra.mxu0 %v669_v54  ;;  %v904_v54 = vld [vmem:[%s1412_s7 + $0x68] sm:$0xf0] }
  0x9a   :  { %v717_v57 = vor.u32 %v904_v54, %v716_v53 }
  0x9b   :  { %569 = vmatpush.bf16.msra.mxu2 %v705_v10  ;;  %v223_v10 = vperm.slane %v220_v9, 1 }
  0x9d   :  { %557 = vmatpush.bf16.msrb.mxu1 %v673_v55  ;;  %589 = vmatpush.bf16.msrb.mxu0 %v881_v58  ;;  %v680_v58 = vld [vmem:[%s1412_s7 + $0x10] sm:$0xf] }
  0x9e   :  { %v681_v0 = vor.u32 %v896_v59, %v680_v58 }
  0xa1   :  { %602 = vmatpush.bf16.msra.mxu1 %v885_v60  ;;  %590 = vmatpush.bf16.msrb.mxu0 %v853_v5  ;;  %v893_v60 = vld [vmem:[%s1412_s7 + $0x14] sm:$0xf] }
  0xa2   :  { %v685_v1 = vor.u32 %v893_v60, %v682_v61 }
  0xa5   :  { %603 = vmatpush.bf16.msra.mxu1 %v857_v6  ;;  %591 = vmatpush.bf16.msrb.mxu0 %v825_v15 }
  0xa9   :  { %604 = vmatpush.bf16.msra.mxu1 %v829_v18  ;;  %592 = vmatpush.bf16.msrb.mxu0 %v797_v27 }
  0xad   :  { %605 = vmatpush.bf16.msra.mxu1 %v801_v30  ;;  %593 = vmatpush.bf16.msrb.mxu0 %v769_v38 }
  0xb1   :  { %594 = vmatpush.bf16.msrb.mxu0 %v741_v47 }
 0x10f   :  { %v95_v37 = vpop.f32.mrf.mxu1 }
 0x110   :  { %v96_v43 = vadd.f32 %v950_v19, %v95_v37  ;;  %v892_v19 = vld [vmem:[%s1412_s7 + $0xc] sm:$0xf]  ;;  %v918_v37 = vld [vmem:[%s1412_s7 + $0xd8] sm:$0xf0] }
 0x111   :  { %v677_v22 = vor.u32 %v892_v19, %v674_v20  ;;  %v773_v39 = vor.u32 %v918_v37, %v772_v36 }
 0x112   :  { %v99_v50 = vmax.f32 %v96_v43, 0.0  ;;  %v737_v43 = vor.u32 %v910_v41, %v736_v40 }
 0x113   :  { %570 = vmatpush.bf16.msra.mxu2 %v677_v22  ;;  %606 = vmatpush.bf16.msra.mxu1 %v773_v39 }
 0x114   :  { %v100_v56 = vpack.c.bf16 %v99_v50, %v99_v50  ;;  %v903_v50 = vld [vmem:[%s1412_s7 + $0x60] sm:$0xf0]  ;;  %581 = vmatpush.bf16.msrb.mxu3 %v737_v43 }
 0x115   :  { %v709_v55 = vor.u32 %v903_v50, %v708_v49 }
 0x116   :  { %661 = vmatmul.msk.bf16.vlgmr.msrb.gmra.mxu2 %vm137_vm5, %v100_v56  ;;  %v713_v56 = vor.u32 %v900_v51, %v710_v52 }
 0x117   :  { %v97_v3 = vpop.f32.mrf.mxu1  ;;  %607 = vmatpush.bf16.msra.mxu1 %v745_v48 }
 0x118   :  { %582 = vmatpush.bf16.msrb.mxu3 %v709_v55  ;;  %595 = vmatpush.bf16.msrb.mxu0 %v713_v56  ;;  %v951_v3 = vld [vmem:[%s1411_s6] ss:$0 sm:$0xff]  ;;  %s979_s6 = smov [#allocation2]  }
 0x119   :  { %s628_s8 = sshll.u32 %s979_s6, 4  ;;  %s629_s8 = int_to_ptr.vmem [resolvable:$true] %s628_s8 }
 0x11b   :  { %608 = vmatpush.bf16.msra.mxu1 %v717_v57 }
 0x11c   :  { %583 = vmatpush.bf16.msrb.mxu3 %v681_v0  ;;  %596 = vmatpush.bf16.msrb.mxu0 %v685_v1 }
 0x11f   :  { %609 = vmatpush.bf16.msra.mxu1 %v689_v2 }
 0x199   :  { %v150_v4 = vpop.f32.mrf.mxu2 }
 0x19a   :  { %v151_v5 = vadd.f32 %v951_v3, %v150_v4 }
 0x19c   :  { %v154_v6 = vmax.f32 %v151_v5, 0.0 }
 0x19e   :  { %v155_v7 = vpack.c.bf16 %v154_v6, %v154_v6 }
 0x1a0   :  { %532 = vmatmul.bf16.vlgmr.msra.gmra.mxu3 %v155_v7  ;;  %545 = vmatmul.bf16.vlgmr.msra.gmra.mxu0 %v155_v7 }
 0x1a1   :  { %558 = vmatmul.bf16.vlgmr.msrb.gmra.mxu1 %v155_v7  ;;  %571 = vmatmul.bf16.vlgmr.msra.gmra.mxu2 %v155_v7  ;;  %v152_v8 = vpop.f32.mrf.mxu2 }
 0x1b0   :  { %584 = vmatmul.bf16.vlgmr.msrb.gmra.mxu3 %v155_v7  ;;  %597 = vmatmul.bf16.vlgmr.msrb.gmra.mxu0 %v155_v7 }
 0x1b1   :  { %610 = vmatmul.bf16.vlgmr.msra.gmra.mxu1 %v155_v7 }
 0x21d   :  { %v546_v12 = vpop.f32.mrf.mxu0 }
 0x21e   :  { %v547_v13 = vadd.f32 %v546_v12, %v223_v10  ;;  %v559_v14 = vpop.f32.mrf.mxu1 }
 0x21f   :  { %v560_v15 = vadd.f32 %v559_v14, %v224_v11 }
 0x220   :  { %616 = vst [vmem:[#allocation2 + $0x8] sm:$0xff] %v547_v13 }
 0x221   :  { %617 = vst [vmem:[#allocation2 + $0x10] sm:$0xff] %v560_v15 }
 0x223   :  { %v533_v18 = vpop.f32.mrf.mxu3 }
 0x224   :  { %v534_v19 = vadd.f32 %v533_v18, %v222_v16  ;;  %v572_v20 = vpop.f32.mrf.mxu2 }
 0x225   :  { %v573_v21 = vadd.f32 %v572_v20, %v225_v17  ;;  %v548_v22 = vpop.f32.mrf.mxu0 }
 0x226   :  { %615 = vst [vmem:[#allocation2] sm:$0xff] %v534_v19  ;;  %v561_v23 = vpop.f32.mrf.mxu1 }
 0x227   :  { %618 = vst [vmem:[#allocation2 + $0x18] sm:$0xff] %v573_v21 }
 0x22b   :  { %v535_v25 = vpop.f32.mrf.mxu3 }
 0x22c   :  { %v574_v27 = vpop.f32.mrf.mxu2 }
 0x22d   :  { %v598_v28 = vpop.f32.mrf.mxu0 }
 0x22e   :  { %v599_v29 = vadd.f32 %v598_v28, %v227_v24  ;;  %v611_v30 = vpop.f32.mrf.mxu1 }
 0x22f   :  { %v612_v31 = vadd.f32 %v611_v30, %v228_v26 }
 0x230   :  { %620 = vst [vmem:[#allocation2 + $0x28] sm:$0xff] %v599_v29 }
 0x231   :  { %622 = vst.msk [vmem:[#allocation2 + $0x30] sm:$0xff] %vm621_vm6, %v612_v31 }
 0x233   :  { %v585_v33 = vpop.f32.mrf.mxu3 }
 0x234   :  { %v586_v34 = vadd.f32 %v585_v33, %v226_v32 }
 0x235   :  { %v600_v35 = vpop.f32.mrf.mxu0 }
 0x236   :  { %619 = vst [vmem:[#allocation2 + $0x20] sm:$0xff] %v586_v34  ;;  %v613_v36 = vpop.f32.mrf.mxu1 }
 0x237   :  { %633 = dma.vmem_to_hbm [thread:$0]  %s629_s8, 896, %s631_s4, [#allocation3]  }
 0x23b   :  { %v587_v37 = vpop.f32.mrf.mxu3 }
 0x23c   :  { %976 = dma.done.wait [#allocation3], 896  }
 0x23d   :  { %977 = vsyncadd [#allocation3], 4294966400 }
 0x23e   :  { %638 = vsyncpa [#allocation3], 1 }

</bundles_post_ra>
